<compile_context>
chip_gen: v6e
topology: v6e:2x2x1
jax: 0.10.0
libtpu: 0.0.40
codegen_flags: <defaults>
</compile_context>

<pallas_src>
import functools

import jax
import jax.numpy as jnp
from jax.experimental import pallas as pl
from jax.experimental.pallas import tpu as pltpu

VMEM_LIMIT = 64 * 1024 * 1024  # fits v5e/v6e (128 MiB) and v7x (64 MiB)


# ------------------------------ tiling helpers ------------------------------

def _pick_tile(m, cap=512):
    """Largest multiple of 8 that is <= cap and divides m (fallback: m)."""
    t = min(cap, m)
    t -= t % 8
    while t >= 8:
        if m % t == 0:
            return t
        t -= 8
    return m


def _pick_k_tile(k, cap=512):
    """Full K if small, else the largest 128-multiple divisor <= cap."""
    if k <= cap:
        return k
    t = cap - cap % 128
    while t >= 128:
        if k % t == 0:
            return t
        t -= 128
    return k


def _rup(c, m=128):
    return ((c + m - 1) // m) * m


def _pad_vec(v, cp, fill=0.0):
    c = v.shape[0]
    if cp == c:
        return v
    return jnp.concatenate([v, jnp.full((cp - c,), fill, v.dtype)])


def _pad_mat(w, kp, np_):
    k, n = w.shape
    return jnp.pad(w, ((0, kp - k), (0, np_ - n)))


# ----------------------------- Pallas kernels -------------------------------

def _matmul_stats_kernel(x_ref, w_ref, y_ref, sum_ref, sq_ref, acc_ref):
    """y = x @ w (bf16 operands, f32 accumulate) with fused per-channel
    sum / sum-of-squares (BN batch statistics) in the epilogue."""
    k = pl.program_id(1)
    nk = pl.num_programs(1)

    @pl.when(k == 0)
    def _():
        acc_ref[...] = jnp.zeros_like(acc_ref)

    acc_ref[...] += jnp.dot(x_ref[...], w_ref[...],
                            preferred_element_type=jnp.float32)

    @pl.when(jnp.logical_and(pl.program_id(0) == 0, k == 0))
    def _():
        sum_ref[...] = jnp.zeros_like(sum_ref)
        sq_ref[...] = jnp.zeros_like(sq_ref)

    @pl.when(k == nk - 1)
    def _():
        y = acc_ref[...]
        y_ref[...] = y
        sum_ref[...] += jnp.sum(y, axis=0, keepdims=True)
        sq_ref[...] += jnp.sum(y * y, axis=0, keepdims=True)


def matmul_stats(x, w):
    """(M, K) @ (K, N) -> (y f32, sum (1,N), sumsq (1,N)).  M and K tiled."""
    M, K = x.shape
    K2, N = w.shape
    assert K == K2
    tm = _pick_tile(M, 512)
    tk = _pick_k_tile(K, 512)
    return pl.pallas_call(
        _matmul_stats_kernel,
        out_shape=(jax.ShapeDtypeStruct((M, N), jnp.float32),
                   jax.ShapeDtypeStruct((1, N), jnp.float32),
                   jax.ShapeDtypeStruct((1, N), jnp.float32)),
        grid=(M // tm, K // tk),
        in_specs=[
            pl.BlockSpec((tm, tk), lambda i, k: (i, k)),
            pl.BlockSpec((tk, N), lambda i, k: (k, 0)),
        ],
        out_specs=(
            pl.BlockSpec((tm, N), lambda i, k: (i, 0)),
            pl.BlockSpec((1, N), lambda i, k: (0, 0)),
            pl.BlockSpec((1, N), lambda i, k: (0, 0)),
        ),
        scratch_shapes=[pltpu.VMEM((tm, N), jnp.float32)],
        compiler_params=pltpu.CompilerParams(
            dimension_semantics=("arbitrary", "arbitrary"),
            vmem_limit_bytes=VMEM_LIMIT),
    )(x, w)


def _conv3x3_s1_kernel(x_ref, w_ref, y_ref, sum_ref, sq_ref, *, H, W, C):
    """3x3, pad=1, stride=1 conv for one image, accumulated over the 9 taps
    in-kernel (no HBM im2col).  The input plane is flattened to rows of length
    W+2; each tap is a contiguous row-range slice.  The two wrap-around
    columns per output row are masked out of the fused BN statistics."""
    Wp = W + 2
    R = H * Wp
    Co = y_ref.shape[-1]

    acc = jnp.zeros((R, Co), jnp.float32)
    for kh in range(3):
        for kw in range(3):
            off = kh * Wp + kw
            t = kh * 3 + kw
            acc = acc + jnp.dot(x_ref[off:off + R, :],
                                w_ref[t * C:(t + 1) * C, :],
                                preferred_element_type=jnp.float32)

    col = jax.lax.broadcasted_iota(jnp.int32, (R, 1), 0) % Wp
    acc = jnp.where(col < W, acc, 0.0)

    @pl.when(pl.program_id(0) == 0)
    def _():
        sum_ref[...] = jnp.zeros_like(sum_ref)
        sq_ref[...] = jnp.zeros_like(sq_ref)

    sum_ref[...] += jnp.sum(acc, axis=0, keepdims=True)
    sq_ref[...] += jnp.sum(acc * acc, axis=0, keepdims=True)
    y_ref[...] = acc


def conv3x3_grouped(h_flat, w_taps, N, H, W, C, Co):
    """Grouped 3x3, pad=1, stride=1 conv.  h_flat: (N*H*W, C) bf16,
    w_taps: (9*C, Co) block-diagonal per-tap dense weight (bf16)."""
    Wp = W + 2
    x = h_flat.reshape(N, H, W, C)
    # one extra zero row at the bottom keeps every in-kernel tap slice in bounds
    xp = jnp.pad(x, ((0, 0), (1, 2), (1, 1), (0, 0)))
    xf = xp.reshape(N, (H + 3) * Wp, C)

    kern = functools.partial(_conv3x3_s1_kernel, H=H, W=W, C=C)
    y, s, sq = pl.pallas_call(
        kern,
        out_shape=(jax.ShapeDtypeStruct((N, H * Wp, Co), jnp.float32),
                   jax.ShapeDtypeStruct((1, Co), jnp.float32),
                   jax.ShapeDtypeStruct((1, Co), jnp.float32)),
        grid=(N,),
        in_specs=[
            pl.BlockSpec((None, (H + 3) * Wp, C), lambda n: (n, 0, 0)),
            pl.BlockSpec((9 * C, Co), lambda n: (0, 0)),
        ],
        out_specs=(
            pl.BlockSpec((None, H * Wp, Co), lambda n: (n, 0, 0)),
            pl.BlockSpec((1, Co), lambda n: (0, 0)),
            pl.BlockSpec((1, Co), lambda n: (0, 0)),
        ),
        compiler_params=pltpu.CompilerParams(
            dimension_semantics=("arbitrary",),
            vmem_limit_bytes=VMEM_LIMIT),
    )(xf, w_taps)
    # drop the two wrap columns per row -> (N, H, W, Co)
    # TODO(synk): for large feature maps, tile spatial rows (needs halo DMA) and
    # write the compact layout directly instead of slicing here.
    y = y.reshape(N, H, Wp, Co)[:, :, :W, :]
    return y, s, sq


def _stats_kernel(y_ref, sum_ref, sq_ref):
    @pl.when(pl.program_id(0) == 0)
    def _():
        sum_ref[...] = jnp.zeros_like(sum_ref)
        sq_ref[...] = jnp.zeros_like(sq_ref)
    y = y_ref[...]
    sum_ref[...] += jnp.sum(y, axis=0, keepdims=True)
    sq_ref[...] += jnp.sum(y * y, axis=0, keepdims=True)


def channel_stats(y):
    """Standalone per-channel sum/sumsq (only used on the stride>1 fallback)."""
    M, C = y.shape
    tm = _pick_tile(M, 512)
    return pl.pallas_call(
        _stats_kernel,
        out_shape=(jax.ShapeDtypeStruct((1, C), jnp.float32),
                   jax.ShapeDtypeStruct((1, C), jnp.float32)),
        grid=(M // tm,),
        in_specs=[pl.BlockSpec((tm, C), lambda i: (i, 0))],
        out_specs=(pl.BlockSpec((1, C), lambda i: (0, 0)),
                   pl.BlockSpec((1, C), lambda i: (0, 0))),
        compiler_params=pltpu.CompilerParams(
            dimension_semantics=("arbitrary",),
            vmem_limit_bytes=VMEM_LIMIT),
    )(y)


def _affine_act_kernel(*refs, relu, has_res, res_affine):
    """out = [relu]( y*s + b  [+ r  or  + r*rs + rb] ), per-channel s/b."""
    if has_res and res_affine:
        y_ref, s_ref, b_ref, r_ref, rs_ref, rb_ref, o_ref = refs
    elif has_res:
        y_ref, s_ref, b_ref, r_ref, o_ref = refs
    else:
        y_ref, s_ref, b_ref, o_ref = refs
    out = y_ref[...] * s_ref[...] + b_ref[...]
    if has_res:
        r = r_ref[...]
        if res_affine:
            r = r * rs_ref[...] + rb_ref[...]
        out = out + r
    if relu:
        out = jnp.maximum(out, 0.0)
    o_ref[...] = out.astype(o_ref.dtype)


def affine_act(y, scale, bias, residual=None, res_scale=None, res_bias=None,
               relu=True, out_dtype=jnp.float32):
    M, C = y.shape
    tm = _pick_tile(M, 512)
    has_res = residual is not None
    res_affine = res_scale is not None
    args = [y, scale, bias]
    in_specs = [
        pl.BlockSpec((tm, C), lambda i: (i, 0)),
        pl.BlockSpec((1, C), lambda i: (0, 0)),
        pl.BlockSpec((1, C), lambda i: (0, 0)),
    ]
    if has_res:
        args.append(residual)
        in_specs.append(pl.BlockSpec((tm, C), lambda i: (i, 0)))
        if res_affine:
            args += [res_scale, res_bias]
            in_specs += [pl.BlockSpec((1, C), lambda i: (0, 0)),
                         pl.BlockSpec((1, C), lambda i: (0, 0))]
    kern = functools.partial(_affine_act_kernel, relu=relu,
                             has_res=has_res, res_affine=res_affine)
    return pl.pallas_call(
        kern,
        out_shape=jax.ShapeDtypeStruct((M, C), out_dtype),
        grid=(M // tm,),
        in_specs=in_specs,
        out_specs=pl.BlockSpec((tm, C), lambda i: (i, 0)),
        compiler_params=pltpu.CompilerParams(
            dimension_semantics=("parallel",),
            vmem_limit_bytes=VMEM_LIMIT),
    )(*args)


# --------------------------------- glue -------------------------------------

def fold_bn(s, sq, m, gamma, beta, eps=1e-5):
    """Fold training-mode BN (batch stats) into per-channel scale/bias."""
    mean = s / m
    var = jnp.maximum(sq / m - mean * mean, 0.0)   # guard cancellation
    scale = gamma.reshape(1, -1) / jnp.sqrt(var + eps)
    bias = beta.reshape(1, -1) - mean * scale
    return scale, bias


def grouped_w_to_taps(w, groups, cin_p, cout_p):
    """(Cout, Cin/groups, 3, 3) grouped weight -> (9*cin_p, cout_p) per-tap
    block-diagonal dense weight (K ordered tap-major, then input channel)."""
    Cout, cpg, KH, KW = w.shape
    opg = Cout // groups
    taps = jnp.zeros((KH * KW, cin_p, cout_p), w.dtype)
    for kh in range(KH):
        for kw in range(KW):
            t = kh * KW + kw
            for g in range(groups):
                blk = jnp.transpose(w[g * opg:(g + 1) * opg, :, kh, kw])
                taps = taps.at[t, g * cpg:(g + 1) * cpg,
                               g * opg:(g + 1) * opg].set(blk)
    return taps.reshape(KH * KW * cin_p, cout_p)


def init_block_params(key, in_planes, cardinality, bottleneck_width, stride):
    gw = cardinality * bottleneck_width
    exp = 2
    ks = jax.random.split(key, 12)

    def conv_w(k, shape):
        fan_in = shape[1] * shape[2] * shape[3]
        bound = 1.0 / (fan_in ** 0.5)
        return jax.random.uniform(k, shape, jnp.float32, -bound, bound)

    p = {
        "w1": conv_w(ks[0], (gw, in_planes, 1, 1)),
        "w2": conv_w(ks[1], (gw, gw // cardinality, 3, 3)),
        "w3": conv_w(ks[2], (exp * gw, gw, 1, 1)),
        "g1": jax.random.uniform(ks[3], (gw,), jnp.float32, 0.5, 1.5),
        "b1": 0.1 * jax.random.normal(ks[4], (gw,), jnp.float32),
        "g2": jax.random.uniform(ks[5], (gw,), jnp.float32, 0.5, 1.5),
        "b2": 0.1 * jax.random.normal(ks[6], (gw,), jnp.float32),
        "g3": jax.random.uniform(ks[7], (exp * gw,), jnp.float32, 0.5, 1.5),
        "b3": 0.1 * jax.random.normal(ks[8], (exp * gw,), jnp.float32),
        "has_shortcut": (stride != 1 or in_planes != exp * gw),
    }
    if p["has_shortcut"]:
        p["wsc"] = conv_w(ks[9], (exp * gw, in_planes, 1, 1))
        p["gsc"] = jax.random.uniform(ks[10], (exp * gw,), jnp.float32, 0.5, 1.5)
        p["bsc"] = 0.1 * jax.random.normal(ks[11], (exp * gw,), jnp.float32)
    return p


def block_forward_pallas(params, x_nchw, cardinality, stride):
    N, Cin, H, W = x_nchw.shape
    gw = params["w1"].shape[0]
    out_c = params["w3"].shape[0]
    cin_p, gw_p, out_p = _rup(Cin), _rup(gw), _rup(out_c)

    x = jnp.transpose(x_nchw, (0, 2, 3, 1)).astype(jnp.float32)      # NHWC
    x_p = jnp.pad(x, ((0, 0), (0, 0), (0, 0), (0, cin_p - Cin)))
    M1 = N * H * W

    # ---- conv1 (1x1) + fused BN1 stats; bn1+relu ----
    w1 = _pad_mat(jnp.transpose(params["w1"][:, :, 0, 0]), cin_p, gw_p)
    y1, s1, q1 = matmul_stats(x_p.reshape(M1, cin_p).astype(jnp.bfloat16),
                              w1.astype(jnp.bfloat16))
    sc1, bi1 = fold_bn(s1, q1, M1, _pad_vec(params["g1"], gw_p),
                       _pad_vec(params["b1"], gw_p))
    h1 = affine_act(y1, sc1, bi1, relu=True, out_dtype=jnp.bfloat16)

    # ---- conv2 (3x3 grouped, pad=1) + fused BN2 stats; bn2+relu ----
    w2 = grouped_w_to_taps(params["w2"], cardinality, gw_p, gw_p)
    y2, s2, q2 = conv3x3_grouped(h1, w2.astype(jnp.bfloat16),
                                 N, H, W, gw_p, gw_p)
    if stride == 1:
        Ho, Wo = H, W
    else:
        # TODO(synk): stride>1 falls back to full-resolution conv + subsample
        # (correct, but wastes stride^2 MXU work); stats recomputed on kept rows.
        y2 = y2[:, ::stride, ::stride, :]
        Ho, Wo = y2.shape[1], y2.shape[2]
    M2 = N * Ho * Wo
    y2f = y2.reshape(M2, gw_p)
    if stride != 1:
        s2, q2 = channel_stats(y2f)
    sc2, bi2 = fold_bn(s2, q2, M2, _pad_vec(params["g2"], gw_p),
                       _pad_vec(params["b2"], gw_p))
    h2 = affine_act(y2f, sc2, bi2, relu=True, out_dtype=jnp.bfloat16)

    # ---- conv3 (1x1) + fused BN3 stats ----
    w3 = _pad_mat(jnp.transpose(params["w3"][:, :, 0, 0]), gw_p, out_p)
    y3, s3, q3 = matmul_stats(h2, w3.astype(jnp.bfloat16))
    sc3, bi3 = fold_bn(s3, q3, M2, _pad_vec(params["g3"], out_p),
                       _pad_vec(params["b3"], out_p))

    # ---- shortcut + fused BN3/BNsc/residual/ReLU epilogue ----
    x_s = x_p[:, ::stride, ::stride, :].reshape(M2, cin_p)
    if params["has_shortcut"]:
        wsc = _pad_mat(jnp.transpose(params["wsc"][:, :, 0, 0]), cin_p, out_p)
        ysc, ss, qs = matmul_stats(x_s.astype(jnp.bfloat16),
                                   wsc.astype(jnp.bfloat16))
        scs, bis = fold_bn(ss, qs, M2, _pad_vec(params["gsc"], out_p),
                           _pad_vec(params["bsc"], out_p))
        out = affine_act(y3, sc3, bi3, residual=ysc, res_scale=scs,
                         res_bias=bis, relu=True)
    else:
        out = affine_act(y3, sc3, bi3, residual=x_s, relu=True)

    out = out[:, :out_c].reshape(N, Ho, Wo, out_c)
    return jnp.transpose(out, (0, 3, 1, 2))  # NCHW


# Pure-JAX reference (NCHW, same semantics as the PyTorch module in train mode).
# bf16_operands=True emulates bf16 MXU inputs with f32 accumulation.
def block_forward_ref(params, x, cardinality, stride, bf16_operands=False):
    def q(a):
        return a.astype(jnp.bfloat16).astype(jnp.float32) if bf16_operands else a

    def conv(x, w, stride=1, padding=0, groups=1):
        return jax.lax.conv_general_dilated(
            q(x), q(w), (stride, stride), [(padding, padding)] * 2,
            feature_group_count=groups,
            dimension_numbers=("NCHW", "OIHW", "NCHW"),
            precision=jax.lax.Precision.HIGHEST)

    def bn(x, g, b, eps=1e-5):
        mean = jnp.mean(x, axis=(0, 2, 3), keepdims=True)
        var = jnp.var(x, axis=(0, 2, 3), keepdims=True)
        xn = (x - mean) / jnp.sqrt(var + eps)
        return xn * g.reshape(1, -1, 1, 1) + b.reshape(1, -1, 1, 1)

    out = jax.nn.relu(bn(conv(x, params["w1"]), params["g1"], params["b1"]))
    out = jax.nn.relu(bn(conv(out, params["w2"], stride=stride, padding=1,
                              groups=cardinality), params["g2"], params["b2"]))
    out = bn(conv(out, params["w3"]), params["g3"], params["b3"])
    if params["has_shortcut"]:
        sc = bn(conv(x, params["wsc"], stride=stride),
                params["gsc"], params["bsc"])
    else:
        sc = x
    return jax.nn.relu(out + sc)


if __name__ == "__main__":
    key = jax.random.PRNGKey(0)

    configs = [
        # (batch, in_planes, H, W, cardinality, bottleneck_width, stride)
        (2, 16, 8, 8, 4, 8, 1),   # projection shortcut (1x1 conv + BN)
        (2, 64, 8, 8, 4, 8, 1),   # identity shortcut
    ]
    for cfg_i, (batch, in_planes, H, W, card, bw, stride) in enumerate(configs):
        k_x, k_p, key = jax.random.split(key, 3)
        x = jax.random.normal(k_x, (batch, in_planes, H, W), jnp.float32)
        params = init_block_params(k_p, in_planes, card, bw, stride)

        out = block_forward_pallas(params, x, card, stride)
        out = jax.block_until_ready(out)

        expected_shape = (batch, 2 * card * bw, H // stride, W // stride)
        assert out.shape == expected_shape, (cfg_i, out.shape)

        # Tight check vs. a reference that emulates bf16 MXU operands.
        ref_bf16 = block_forward_ref(params, x, card, stride, bf16_operands=True)
        err_bf16 = float(jnp.max(jnp.abs(out - ref_bf16)))
        assert jnp.allclose(out, ref_bf16, atol=5e-3, rtol=5e-3), (cfg_i, err_bf16)

        # Looser check vs. the pure-f32 module semantics (bf16 operands are a
        # deliberate perf choice; accumulation stays f32).
        ref_f32 = block_forward_ref(params, x, card, stride, bf16_operands=False)
        err_f32 = float(jnp.max(jnp.abs(out - ref_f32)))
        assert jnp.allclose(out, ref_f32, atol=1e-1, rtol=1e-1), (cfg_i, err_f32)

    print("KERNEL_OK")
</pallas_src>

<mosaic_0001>
module attributes {stable_mosaic.version = 11 : i64} {
  func.func @_matmul_stats_kernel(%arg0: i32, %arg1: i32, %arg2: memref<128x128xbf16, #tpu.memory_space<vmem>>, %arg3: memref<128x128xbf16, #tpu.memory_space<vmem>>, %arg4: memref<128x128xf32, #tpu.memory_space<vmem>>, %arg5: memref<1x128xf32, #tpu.memory_space<vmem>>, %arg6: memref<1x128xf32, #tpu.memory_space<vmem>>, %arg7: memref<128x128xf32, #tpu.memory_space<vmem>>) attributes {dimension_semantics = [#tpu.dimension_semantics<arbitrary>, #tpu.dimension_semantics<arbitrary>], iteration_bounds = array<i64: 1, 1>, scalar_prefetch = 0 : i64, scratch_operands = 1 : i64, tpu.core_type = #tpu.core_type<tc>, window_params = [{transform_indices = @transform_0, window_bounds = array<i64: 128, 128>}, {transform_indices = @transform_1, window_bounds = array<i64: 128, 128>}, {transform_indices = @transform_2, window_bounds = array<i64: 128, 128>}, {pipeline_mode = #tpu.pipeline_mode<synchronous>, transform_indices = @transform_3, window_bounds = array<i64: 1, 128>}, {pipeline_mode = #tpu.pipeline_mode<synchronous>, transform_indices = @transform_4, window_bounds = array<i64: 1, 128>}]} {
    %c0_i32 = arith.constant 0 : i32
    %0 = arith.cmpi eq, %arg1, %c0_i32 : i32
    %1 = arith.extui %0 : i1 to i32
    %c0_i32_0 = arith.constant 0 : i32
    %2 = arith.cmpi ne, %1, %c0_i32_0 : i32
    scf.if %2 {
      %cst_13 = arith.constant 0.000000e+00 : f32
      %17 = vector.broadcast %cst_13 : f32 to vector<128x128xf32>
      %c0_14 = arith.constant 0 : index
      %c0_15 = arith.constant 0 : index
      %18 = vector.load %arg7[%c0_14, %c0_15] : memref<128x128xf32, #tpu.memory_space<vmem>>, vector<128x128xf32>
      tpu.vector_store %arg7[%c0_14, %c0_15], %17 {strides = array<i32>} : memref<128x128xf32, #tpu.memory_space<vmem>>, vector<128x128xf32>,
    } else {
    }
    %c0 = arith.constant 0 : index
    %c0_1 = arith.constant 0 : index
    %3 = vector.load %arg7[%c0, %c0_1] : memref<128x128xf32, #tpu.memory_space<vmem>>, vector<128x128xf32>
    %c0_2 = arith.constant 0 : index
    %c0_3 = arith.constant 0 : index
    %4 = vector.load %arg2[%c0_2, %c0_3] : memref<128x128xbf16, #tpu.memory_space<vmem>>, vector<128x128xbf16>
    %c0_4 = arith.constant 0 : index
    %c0_5 = arith.constant 0 : index
    %5 = vector.load %arg3[%c0_4, %c0_5] : memref<128x128xbf16, #tpu.memory_space<vmem>>, vector<128x128xbf16>
    %cst = arith.constant dense<0.000000e+00> : vector<128x128xf32>
    %6 = tpu.matmul %4, %5, %cst {dimension_numbers = #tpu.dot_dimension_numbers<[1], [0], [0], [1], [0, 0, 1, 1], [], []>} : vector<128x128xbf16>, vector<128x128xbf16>, vector<128x128xf32> -> vector<128x128xf32>
    %7 = arith.addf %3, %6 : vector<128x128xf32>
    %c0_6 = arith.constant 0 : index
    %c0_7 = arith.constant 0 : index
    %8 = vector.load %arg7[%c0_6, %c0_7] : memref<128x128xf32, #tpu.memory_space<vmem>>, vector<128x128xf32>
    tpu.vector_store %arg7[%c0_6, %c0_7], %7 {strides = array<i32>} : memref<128x128xf32, #tpu.memory_space<vmem>>, vector<128x128xf32>,
    %c0_i32_8 = arith.constant 0 : i32
    %9 = arith.cmpi eq, %arg0, %c0_i32_8 : i32
    %c0_i32_9 = arith.constant 0 : i32
    %10 = arith.cmpi eq, %arg1, %c0_i32_9 : i32
    %11 = arith.andi %9, %10 : i1
    %12 = arith.extui %11 : i1 to i32
    %c0_i32_10 = arith.constant 0 : i32
    %13 = arith.cmpi ne, %12, %c0_i32_10 : i32
    scf.if %13 {
      %cst_13 = arith.constant 0.000000e+00 : f32
      %17 = vector.broadcast %cst_13 : f32 to vector<1x128xf32>
      %c0_14 = arith.constant 0 : index
      %c0_15 = arith.constant 0 : index
      %18 = vector.load %arg5[%c0_14, %c0_15] : memref<1x128xf32, #tpu.memory_space<vmem>>, vector<1x128xf32>
      tpu.vector_store %arg5[%c0_14, %c0_15], %17 {strides = array<i32>} : memref<1x128xf32, #tpu.memory_space<vmem>>, vector<1x128xf32>,
      %cst_16 = arith.constant 0.000000e+00 : f32
      %19 = vector.broadcast %cst_16 : f32 to vector<1x128xf32>
      %c0_17 = arith.constant 0 : index
      %c0_18 = arith.constant 0 : index
      %20 = vector.load %arg6[%c0_17, %c0_18] : memref<1x128xf32, #tpu.memory_space<vmem>>, vector<1x128xf32>
      tpu.vector_store %arg6[%c0_17, %c0_18], %19 {strides = array<i32>} : memref<1x128xf32, #tpu.memory_space<vmem>>, vector<1x128xf32>,
    } else {
    }
    %c0_i32_11 = arith.constant 0 : i32
    %14 = arith.cmpi eq, %arg1, %c0_i32_11 : i32
    %15 = arith.extui %14 : i1 to i32
    %c0_i32_12 = arith.constant 0 : i32
    %16 = arith.cmpi ne, %15, %c0_i32_12 : i32
    scf.if %16 {
      %c0_13 = arith.constant 0 : index
      %c0_14 = arith.constant 0 : index
      %17 = vector.load %arg7[%c0_13, %c0_14] : memref<128x128xf32, #tpu.memory_space<vmem>>, vector<128x128xf32>
      %c0_15 = arith.constant 0 : index
      %c0_16 = arith.constant 0 : index
      %18 = vector.load %arg4[%c0_15, %c0_16] : memref<128x128xf32, #tpu.memory_space<vmem>>, vector<128x128xf32>
      tpu.vector_store %arg4[%c0_15, %c0_16], %17 {strides = array<i32>} : memref<128x128xf32, #tpu.memory_space<vmem>>, vector<128x128xf32>,
      %c0_17 = arith.constant 0 : index
      %c0_18 = arith.constant 0 : index
      %19 = vector.load %arg5[%c0_17, %c0_18] : memref<1x128xf32, #tpu.memory_space<vmem>>, vector<1x128xf32>
      %cst_19 = arith.constant dense<0.000000e+00> : vector<128xf32>
      %20 = vector.multi_reduction <add>, %17, %cst_19 [0] : vector<128x128xf32> to vector<128xf32>
      %21 = vector.shape_cast %20 : vector<128xf32> to vector<1x128xf32>
      %22 = arith.addf %19, %21 : vector<1x128xf32>
      %c0_20 = arith.constant 0 : index
      %c0_21 = arith.constant 0 : index
      %23 = vector.load %arg5[%c0_20, %c0_21] : memref<1x128xf32, #tpu.memory_space<vmem>>, vector<1x128xf32>
      tpu.vector_store %arg5[%c0_20, %c0_21], %22 {strides = array<i32>} : memref<1x128xf32, #tpu.memory_space<vmem>>, vector<1x128xf32>,
      %c0_22 = arith.constant 0 : index
      %c0_23 = arith.constant 0 : index
      %24 = vector.load %arg6[%c0_22, %c0_23] : memref<1x128xf32, #tpu.memory_space<vmem>>, vector<1x128xf32>
      %25 = arith.mulf %17, %17 : vector<128x128xf32>
      %cst_24 = arith.constant dense<0.000000e+00> : vector<128xf32>
      %26 = vector.multi_reduction <add>, %25, %cst_24 [0] : vector<128x128xf32> to vector<128xf32>
      %27 = vector.shape_cast %26 : vector<128xf32> to vector<1x128xf32>
      %28 = arith.addf %24, %27 : vector<1x128xf32>
      %c0_25 = arith.constant 0 : index
      %c0_26 = arith.constant 0 : index
      %29 = vector.load %arg6[%c0_25, %c0_26] : memref<1x128xf32, #tpu.memory_space<vmem>>, vector<1x128xf32>
      tpu.vector_store %arg6[%c0_25, %c0_26], %28 {strides = array<i32>} : memref<1x128xf32, #tpu.memory_space<vmem>>, vector<1x128xf32>,
    } else {
    }
    return
  }
  func.func @transform_0(%arg0: i32, %arg1: i32) -> (i32, i32) {
    %c0_i32 = arith.constant 0 : i32
    return %arg0, %arg1 : i32, i32
  }
  func.func @transform_1(%arg0: i32, %arg1: i32) -> (i32, i32) {
    %c0_i32 = arith.constant 0 : i32
    %c0_i32_0 = arith.constant 0 : i32
    return %arg1, %c0_i32 : i32, i32
  }
  func.func @transform_2(%arg0: i32, %arg1: i32) -> (i32, i32) {
    %c0_i32 = arith.constant 0 : i32
    %c0_i32_0 = arith.constant 0 : i32
    return %arg0, %c0_i32 : i32, i32
  }
  func.func @transform_3(%arg0: i32, %arg1: i32) -> (i32, i32) {
    %c0_i32 = arith.constant 0 : i32
    %c0_i32_0 = arith.constant 0 : i32
    %c0_i32_1 = arith.constant 0 : i32
    return %c0_i32, %c0_i32_0 : i32, i32
  }
  func.func @transform_4(%arg0: i32, %arg1: i32) -> (i32, i32) {
    %c0_i32 = arith.constant 0 : i32
    %c0_i32_0 = arith.constant 0 : i32
    %c0_i32_1 = arith.constant 0 : i32
    return %c0_i32, %c0_i32_0 : i32, i32
  }
}

</mosaic_0001>

<bundles_post_ra>
// kernel: tpu_custom_call.1
= control target key start
LH: loop header
LB: loop body
LE: loop exit
PB: predicated region body
PF: predicated region fallthrough
CT: control target
= control target key end

     0   :  { %10 = vsyncpa [#allocation4], 0  ;;  %s777_s0 = inlined_call_operand.hbm [shape: bf16[128,128], index: 0, kind: input, shape index: {}]   ;;  %s778_s1 = inlined_call_operand.hbm [shape: bf16[128,128], index: 1, kind: input, shape index: {}]   ;;  %s779_s2 = inlined_call_operand.hbm [shape: f32[128,128], index: 2, kind: output, shape index: {0}]   ;;  %s780_s3 = inlined_call_operand.hbm [shape: f32[1,128], index: 3, kind: output, shape index: {1}]   ;;  %s781_s4 = inlined_call_operand.hbm [shape: f32[1,128], index: 4, kind: output, shape index: {2}]  }
   0x1   :  { %11 = vsyncpa [#allocation7], 0 }
   0x2   :  { %12 = vsyncpa [#allocation5], 0 }
   0x3   :  { %13 = vsyncpa [#allocation10], 0  ;;  %s703_s15 = smov [#allocation3]  }
   0x4   :  { %s19_s16 = sshll.u32 %s703_s15, 4  ;;  %s20_s16 = int_to_ptr.vmem [resolvable:$true] %s19_s16 }
   0x5   :  { %s603_s17 = scalar_lea.vmem %s20_s16, 1024  ;;  %p608_p1 = scmp.lt.s32.totalorder %s20_s16, %s20_s16 }
   0x6   :  { %p604_p0 = scmp.ne.s32.totalorder %s20_s16, %s603_s17  ;;  %p609_p2 = scmp.lt.s32.totalorder %s603_s17, %s603_s17 }
   0x8   :  { %p610_p3 = por %p609_p2, %p608_p1 }
   0xa   :  { %p611_p4 = pnand %p610_p3, %p604_p0 }
   0xc   :  { %614 = shalt.err (!%p611_p4)
}
   0xd   :  { %s704_s18 = smov 64   ;;  %s705_s19 = smov 4  }
   0xe   :  { %25 = dma.hbm_to_vmem [thread:$0]  %s777_s0, 1024, %s20_s16, [#allocation4], %s704_s18, %s704_s18, %s705_s19  }
   0xf   :  { %s706_s22 = smov [#allocation6]  }
  0x10   :  { %s31_s23 = sshll.u32 %s706_s22, 4  ;;  %s32_s23 = int_to_ptr.vmem [resolvable:$true] %s31_s23 }
  0x11   :  { %s623_s24 = scalar_lea.vmem %s32_s23, 1024  ;;  %p628_p6 = scmp.lt.s32.totalorder %s32_s23, %s32_s23 }
  0x12   :  { %p624_p5 = scmp.ne.s32.totalorder %s32_s23, %s623_s24  ;;  %p629_p7 = scmp.lt.s32.totalorder %s623_s24, %s623_s24 }
  0x14   :  { %p630_p8 = por %p629_p7, %p628_p6 }
  0x16   :  { %p631_p9 = pnand %p630_p8, %p624_p5 }
  0x18   :  { %634 = shalt.err (!%p631_p9)
}
  0x19   :  { %37 = dma.hbm_to_vmem [thread:$0]  %s778_s1, 1024, %s32_s23, [#allocation7], %s704_s18, %s704_s18, %s705_s19  }
  0x1a   :  { %695 = dma.done.wait [#allocation4], 1024  }
  0x1b   :  { %696 = vsyncadd [#allocation4], 4294966272 }
  0x1c   :  { %697 = dma.done.wait [#allocation7], 1024  }
  0x1d   :  { %698 = vsyncadd [#allocation7], 4294966272  ;;  %v579_v0 = vld [vmem:[#allocation6 + $0x38] sm:$0xff]   ;;  %v580_v1 = vld [vmem:[#allocation6 + $0x30] sm:$0xff]   ;;  %v707_v16 = vmov 0.0   ;;  %s708_s0 = smov [#allocation8]  }
  0x1e   :  { %521 = vmatprep.subr.bf16.mxu0 %v579_v0  ;;  %553 = vmatprep.subr.bf16.mxu1 %v579_v0  ;;  %v581_v2 = vld [vmem:[#allocation6 + $0x28] sm:$0xff]   ;;  %v582_v3 = vld [vmem:[#allocation6 + $0x20] sm:$0xff]   ;;  %v583_v5 = vld [vmem:[#allocation6 + $0x18] sm:$0xff]   ;;  %343 = vst [vmem:[#allocation9] sm:$0x1] %v707_v16  ;;  %s449_s1 = sshll.u32 %s708_s0, 4  ;;  %s450_s1 = int_to_ptr.vmem [resolvable:$true] %s449_s1 }
  0x1f   :  { %522 = vmatpush3.bf16.msra.mxu0 %v579_v0  ;;  %561 = vmatpush3.bf16.msra.mxu1 %v579_v0  ;;  %v587_v4 = vld [vmem:[#allocation3] sm:$0xff]   ;;  %v584_v7 = vld [vmem:[#allocation6 + $0x10] sm:$0xff]   ;;  %v585_v8 = vld [vmem:[#allocation6 + $0x8] sm:$0xff]   ;;  %344 = vst [vmem:[#allocation11] sm:$0x1] %v707_v16  ;;  %s635_s27 = scalar_lea.vmem %s450_s1, 2048  ;;  %p640_p11 = scmp.lt.s32.totalorder %s450_s1, %s450_s1 }
  0x20   :  { %523 = vmatprep.subr.bf16.mxu0 %v580_v1  ;;  %554 = vmatprep.subr.bf16.mxu1 %v580_v1  ;;  %v591_v6 = vld [vmem:[#allocation3 + $0x20] sm:$0xff]   ;;  %v588_v10 = vld [vmem:[#allocation3 + $0x8] sm:$0xff]   ;;  %v589_v12 = vld [vmem:[#allocation3 + $0x10] sm:$0xff]   ;;  %p636_p10 = scmp.ne.s32.totalorder %s450_s1, %s635_s27  ;;  %p641_p12 = scmp.lt.s32.totalorder %s635_s27, %s635_s27 }
  0x21   :  { %537 = vmatprep.mubr.bf16.mxu0 %v587_v4  ;;  %545 = vmatprep.mubr.bf16.mxu1 %v591_v6  ;;  %v586_v9 = vld [vmem:[#allocation6] sm:$0xff]   ;;  %v592_v11 = vld [vmem:[#allocation3 + $0x28] sm:$0xff]   ;;  %v593_v13 = vld [vmem:[#allocation3 + $0x30] sm:$0xff]  }
  0x22   :  { %v590_v14 = vld [vmem:[#allocation3 + $0x18] sm:$0xff]   ;;  %p642_p13 = por %p641_p12, %p640_p11 }
  0x23   :  { %524 = vmatpush3.bf16.msra.mxu0 %v580_v1  ;;  %562 = vmatpush3.bf16.msra.mxu1 %v580_v1  ;;  %v594_v15 = vld [vmem:[#allocation3 + $0x38] sm:$0xff]  }
  0x24   :  { %525 = vmatprep.subr.bf16.mxu0 %v581_v2  ;;  %555 = vmatprep.subr.bf16.mxu1 %v581_v2  ;;  %p643_p0 = pnand %p642_p13, %p636_p10 }
  0x27   :  { %526 = vmatpush3.bf16.msra.mxu0 %v581_v2  ;;  %563 = vmatpush3.bf16.msra.mxu1 %v581_v2 }
  0x28   :  { %527 = vmatprep.subr.bf16.mxu0 %v582_v3  ;;  %556 = vmatprep.subr.bf16.mxu1 %v582_v3 }
  0x2b   :  { %528 = vmatpush3.bf16.msra.mxu0 %v582_v3  ;;  %564 = vmatpush3.bf16.msra.mxu1 %v582_v3 }
  0x2c   :  { %529 = vmatprep.subr.bf16.mxu0 %v583_v5  ;;  %557 = vmatprep.subr.bf16.mxu1 %v583_v5 }
  0x2f   :  { %530 = vmatpush3.bf16.msra.mxu0 %v583_v5  ;;  %565 = vmatpush3.bf16.msra.mxu1 %v583_v5 }
  0x30   :  { %531 = vmatprep.subr.bf16.mxu0 %v584_v7  ;;  %558 = vmatprep.subr.bf16.mxu1 %v584_v7 }
  0x33   :  { %532 = vmatpush3.bf16.msra.mxu0 %v584_v7  ;;  %566 = vmatpush3.bf16.msra.mxu1 %v584_v7 }
  0x34   :  { %533 = vmatprep.subr.bf16.mxu0 %v585_v8  ;;  %559 = vmatprep.subr.bf16.mxu1 %v585_v8 }
  0x37   :  { %534 = vmatpush3.bf16.msra.mxu0 %v585_v8  ;;  %567 = vmatpush3.bf16.msra.mxu1 %v585_v8 }
  0x38   :  { %535 = vmatprep.subr.bf16.mxu0 %v586_v9  ;;  %560 = vmatprep.subr.bf16.mxu1 %v586_v9 }
  0x3b   :  { %536 = vmatpush3.bf16.msra.mxu0 %v586_v9  ;;  %568 = vmatpush3.bf16.msra.mxu1 %v586_v9 }
  0x3e   :  { %538 = vmatmul.mubr.bf16.vlgmr.msra.gmra.mxu0 %v588_v10  ;;  %546 = vmatmul.mubr.bf16.vlgmr.msra.gmra.mxu1 %v592_v11 }
  0x3f   :  { %541 = vmatprep.mubr.bf16.mxu0 %v589_v12  ;;  %549 = vmatprep.mubr.bf16.mxu1 %v593_v13 }
  0x46   :  { %542 = vmatmul.mubr.bf16.gmra.mxu0 %v590_v14  ;;  %550 = vmatmul.mubr.bf16.gmra.mxu1 %v594_v15 }
  0xfe   :  { %v539_v17 = vpop.f32.mrf.mxu0  ;;  %v744_v18 = vpop.f32.mrf.mxu1 }
  0xff   :  { %366 = vst [vmem:[#allocation8 + $0x10] sm:$0xff] %v539_v17  ;;  %374 = vst [vmem:[#allocation8 + $0x50] sm:$0xff] %v744_v18  ;;  %v407_v30 = vmul.f32 %v539_v17, %v539_v17 }
 0x100   :  { %v243_v19 = vpop.f32.mrf.mxu0  ;;  %v747_v20 = vpop.f32.mrf.mxu1 }
 0x101   :  { %364 = vst [vmem:[#allocation8] sm:$0xff] %v243_v19  ;;  %372 = vst [vmem:[#allocation8 + $0x40] sm:$0xff] %v747_v20  ;;  %v405_v25 = vmul.f32 %v243_v19, %v243_v19 }
 0x102   :  { %v540_v21 = vpop.f32.mrf.mxu0  ;;  %v750_v22 = vpop.f32.mrf.mxu1 }
 0x103   :  { %367 = vst [vmem:[#allocation8 + $0x18] sm:$0xff] %v540_v21  ;;  %375 = vst [vmem:[#allocation8 + $0x58] sm:$0xff] %v750_v22  ;;  %v408_v35 = vmul.f32 %v540_v21, %v540_v21 }
 0x104   :  { %v246_v23 = vpop.f32.mrf.mxu0  ;;  %v278_v24 = vpop.f32.mrf.mxu1 }
 0x105   :  { %365 = vst [vmem:[#allocation8 + $0x8] sm:$0xff] %v246_v23  ;;  %v381_v26 = vadd.f32 %v246_v23, %v243_v19  ;;  %v406_v27 = vmul.f32 %v246_v23, %v246_v23  ;;  %373 = vst [vmem:[#allocation8 + $0x48] sm:$0xff] %v278_v24 }
 0x106   :  { %v543_v28 = vpop.f32.mrf.mxu0  ;;  %v753_v29 = vpop.f32.mrf.mxu1 }
 0x107   :  { %v382_v31 = vadd.f32 %v539_v17, %v381_v26  ;;  %v421_v32 = vadd.f32 %v406_v27, %v405_v25  ;;  %370 = vst [vmem:[#allocation8 + $0x30] sm:$0xff] %v543_v28  ;;  %378 = vst [vmem:[#allocation8 + $0x70] sm:$0xff] %v753_v29 }
 0x108   :  { %v259_v33 = vpop.f32.mrf.mxu0  ;;  %v291_v34 = vpop.f32.mrf.mxu1 }
 0x109   :  { %v422_v36 = vadd.f32 %v421_v32, %v407_v30  ;;  %368 = vst [vmem:[#allocation8 + $0x20] sm:$0xff] %v259_v33  ;;  %v383_v37 = vadd.f32 %v540_v21, %v382_v31  ;;  %376 = vst [vmem:[#allocation8 + $0x60] sm:$0xff] %v291_v34  ;;  %v409_v41 = vmul.f32 %v259_v33, %v259_v33 }
 0x10a   :  { %v544_v38 = vpop.f32.mrf.mxu0  ;;  %v552_v39 = vpop.f32.mrf.mxu1 }
 0x10b   :  { %v384_v40 = vadd.f32 %v383_v37, %v259_v33  ;;  %v423_v42 = vadd.f32 %v422_v36, %v408_v35  ;;  %371 = vst [vmem:[#allocation8 + $0x38] sm:$0xff] %v544_v38  ;;  %379 = vst [vmem:[#allocation8 + $0x78] sm:$0xff] %v552_v39 }
 0x10c   :  { %v262_v43 = vpop.f32.mrf.mxu0  ;;  %v294_v44 = vpop.f32.mrf.mxu1 }
 0x10d   :  { %v424_v45 = vadd.f32 %v423_v42, %v409_v41  ;;  %369 = vst [vmem:[#allocation8 + $0x28] sm:$0xff] %v262_v43  ;;  %v385_v46 = vadd.f32 %v384_v40, %v262_v43  ;;  %v410_v47 = vmul.f32 %v262_v43, %v262_v43  ;;  %377 = vst [vmem:[#allocation8 + $0x68] sm:$0xff] %v294_v44 }
 0x10e   :  { %646 = shalt.err (!%p643_p0)
}
 0x10f   :  { %s709_s28 = smov 128   ;;  %s710_s29 = smov 8   ;;  %v411_v48 = vmul.f32 %v543_v28, %v543_v28  ;;  %v386_v49 = vadd.f32 %v543_v28, %v385_v46  ;;  %v425_v50 = vadd.f32 %v424_v45, %v410_v47  ;;  %v412_v51 = vmul.f32 %v544_v38, %v544_v38  ;;  %v404_v27 = vld [vmem:[#allocation11] sm:$0x1] }
 0x110   :  { %455 = dma.vmem_to_hbm [thread:$0]  %s450_s1, 2048, %s779_s2, [#allocation5], %s709_s28, %s709_s28, %s710_s29   ;;  %v413_v54 = vmul.f32 %v747_v20, %v747_v20  ;;  %v414_v58 = vmul.f32 %v278_v24, %v278_v24  ;;  %v415_v60 = vmul.f32 %v744_v18, %v744_v18  ;;  %v416_v63 = vmul.f32 %v750_v22, %v750_v22 }
 0x111   :  { %v387_v52 = vadd.f32 %v544_v38, %v386_v49  ;;  %v426_v53 = vadd.f32 %v425_v50, %v411_v48  ;;  %v417_v3 = vmul.f32 %v291_v34, %v291_v34  ;;  %v418_v7 = vmul.f32 %v294_v44, %v294_v44  ;;  %s711_s2 = smov [#allocation9]   ;;  %s712_s7 = smov [#allocation11]  }
 0x112   :  { %v419_v8 = vmul.f32 %v753_v29, %v753_v29  ;;  %v420_v11 = vmul.f32 %v552_v39, %v552_v39  ;;  %s462_s6 = sshll.u32 %s711_s2, 4  ;;  %s472_s8 = sshll.u32 %s712_s7, 4  ;;  %s463_s6 = int_to_ptr.vmem [resolvable:$true] %s462_s6  ;;  %s473_s8 = int_to_ptr.vmem [resolvable:$true] %s472_s8 }
 0x113   :  { %v427_v55 = vadd.f32 %v426_v53, %v412_v51  ;;  %v388_v56 = vadd.f32 %v387_v52, %v747_v20  ;;  %s655_s9 = scalar_lea.vmem %s463_s6, 16  ;;  %s659_s10 = scalar_lea.vmem %s463_s6, 32 }
 0x114   :  { %p656_p1 = scmp.ne.s32.totalorder %s463_s6, %s655_s9  ;;  %p660_p2 = scmp.lt.s32.totalorder %s463_s6, %s463_s6 }
 0x115   :  { %v389_v57 = vadd.f32 %v388_v56, %v278_v24  ;;  %v428_v59 = vadd.f32 %v427_v55, %v413_v54  ;;  %v380_v24 = vld [vmem:[#allocation9] sm:$0x1]  ;;  %p661_p3 = scmp.lt.s32.totalorder %s659_s10, %s655_s9 }
 0x117   :  { %v390_v61 = vadd.f32 %v744_v18, %v389_v57  ;;  %v429_v62 = vadd.f32 %v428_v59, %v414_v58  ;;  %p662_p4 = por %p661_p3, %p660_p2 }
 0x119   :  { %v430_v0 = vadd.f32 %v429_v62, %v415_v60  ;;  %v391_v1 = vadd.f32 %v750_v22, %v390_v61  ;;  %p663_p5 = pnand %p662_p4, %p656_p1 }
 0x11b   :  { %v392_v2 = vadd.f32 %v391_v1, %v291_v34  ;;  %v431_v4 = vadd.f32 %v430_v0, %v416_v63 }
 0x11d   :  { %v432_v5 = vadd.f32 %v431_v4, %v417_v3  ;;  %v393_v6 = vadd.f32 %v392_v2, %v294_v44 }
 0x11f   :  { %v394_v9 = vadd.f32 %v753_v29, %v393_v6  ;;  %v433_v10 = vadd.f32 %v432_v5, %v418_v7 }
 0x121   :  { %v395_v12 = vadd.f32 %v552_v39, %v394_v9  ;;  %v434_v13 = vadd.f32 %v433_v10, %v419_v8 }
 0x123   :  { %v396_v14 = vrot.slane %v395_v12, 4  ;;  %v435_v15 = vadd.f32 %v434_v13, %v420_v11 }
 0x125   :  { %v397_v16 = vadd.f32 %v396_v14, %v395_v12  ;;  %v436_v17 = vrot.slane %v435_v15, 4 }
 0x127   :  { %v398_v18 = vrot.slane %v397_v16, 2  ;;  %v437_v19 = vadd.f32 %v436_v17, %v435_v15 }
 0x129   :  { %v399_v20 = vadd.f32 %v398_v18, %v397_v16  ;;  %v438_v21 = vrot.slane %v437_v19, 2 }
 0x12b   :  { %v439_v22 = vadd.f32 %v438_v21, %v437_v19  ;;  %v400_v23 = vrot.slane %v399_v20, 1 }
 0x12d   :  { %v401_v25 = vadd.f32 %v400_v23, %v399_v20  ;;  %v440_v26 = vrot.slane %v439_v22, 1 }
 0x12f   :  { %v402_v28 = vadd.f32 %v401_v25, %v380_v24  ;;  %v441_v29 = vadd.f32 %v440_v26, %v439_v22 }
 0x131   :  { %403 = vst [vmem:[#allocation9] sm:$0x1] %v402_v28  ;;  %v442_v30 = vadd.f32 %v441_v29, %v404_v27 }
 0x132   :  { %666 = shalt.err (!%p663_p5)
}
 0x133   :  { %465 = dma.vmem_to_hbm [thread:$0]  %s463_s6, 16, %s780_s3, [#allocation10]   ;;  %443 = vst [vmem:[#allocation11] sm:$0x1] %v442_v30 }
 0x134   :  { %s675_s13 = scalar_lea.vmem %s473_s8, 16  ;;  %s679_s14 = scalar_lea.vmem %s473_s8, 32 }
 0x135   :  { %p676_p6 = scmp.ne.s32.totalorder %s473_s8, %s675_s13  ;;  %p680_p7 = scmp.lt.s32.totalorder %s473_s8, %s473_s8 }
 0x136   :  { %p681_p8 = scmp.lt.s32.totalorder %s679_s14, %s675_s13 }
 0x138   :  { %p682_p9 = por %p681_p8, %p680_p7 }
 0x13a   :  { %p683_p10 = pnand %p682_p9, %p676_p6 }
 0x13c   :  { %686 = shalt.err (!%p683_p10)
}
 0x13d   :  { %475 = dma.vmem_to_hbm [thread:$0]  %s473_s8, 16, %s781_s4, [#allocation10]  }
 0x13e   :  { %699 = dma.done.wait [#allocation5], 2048  }
 0x13f   :  { %700 = vsyncadd [#allocation5], 4294965248 }
 0x140   :  { %701 = dma.done.wait [#allocation10], 32  }
 0x141   :  { %702 = vsyncadd [#allocation10], 4294967264 }
 0x142   :  { %485 = vsyncpa [#allocation4], 1 }
 0x143   :  { %486 = vsyncpa [#allocation7], 1 }
 0x144   :  { %487 = vsyncpa [#allocation5], 1 }
 0x145   :  { %488 = vsyncpa [#allocation10], 1 }

</bundles_post_ra>
